<compile_context>
chip_gen: v6e
topology: v6e:2x2x1
jax: 0.10.0
libtpu: 0.0.40
codegen_flags: <defaults>
</compile_context>

<pallas_src>
import functools

import numpy as np
import jax
import jax.numpy as jnp
from jax.experimental import pallas as pl
from jax.experimental.pallas import tpu as pltpu


_LANE = 128
_TILE_BYTE_BUDGET = 4 * 1024 * 1024  # per x tile; in/out/scratch are a few x this


def _round_up(x, m):
    return (x + m - 1) // m * m


def _cdiv(a, b):
    return (a + b - 1) // b


def _vmem_limit_bytes():
    """Generation-aware scoped-VMEM request: ~75% of physical per-core VMEM."""
    try:
        cap = pltpu.get_tpu_info().vmem_capacity_bytes
        return int(cap) * 3 // 4
    except Exception:
        return 48 * 1024 * 1024  # safe on all of v5e/v6e/v7x


def _pick_block_rows(n, lane_width, dtype, requested):
    """Row-tile size: big enough to hide per-step grid overhead, small enough
    for VMEM, and small enough that the row grid has >= ~4 steps (megacore)."""
    itemsize = jnp.dtype(dtype).itemsize
    row_align = max(8, 8 * (4 // max(1, itemsize)))  # f32:8, bf16:16, int8:32
    rows = min(requested,
               max(row_align, _TILE_BYTE_BUDGET // max(1, lane_width * itemsize)))
    rows = min(rows, max(row_align, _round_up(_cdiv(n, 4), row_align)))
    rows = min(rows, _round_up(max(n, 1), row_align))
    return max(row_align, _round_up(rows, row_align))


def _invariant_spec(shape, index_map):
    """BlockSpec for a grid-invariant input: single-buffer it (it is DMA'd
    exactly once; double-buffering would only waste VMEM)."""
    return pl.BlockSpec(shape, index_map, pipeline_mode=pl.Buffered(1))


# -----------------------------------------------------------------------------
# Kernels
# -----------------------------------------------------------------------------

def _layernorm_body(x, g, b, *, eps, d_true):
    """x: (tm, Dp) f32, padded lanes (>= d_true) hold zeros; g/b: (1, Dp) f32
    with zero-padded lanes so padded output lanes come out exactly zero."""
    d_pad = x.shape[-1]
    inv_d = 1.0 / d_true
    mean = jnp.sum(x, axis=-1, keepdims=True) * inv_d
    centered = x - mean
    sq = jnp.sum(centered * centered, axis=-1, keepdims=True)
    if d_pad != d_true:
        # Each zero-padded lane contributes (0 - mean)^2 = mean^2 to the sum;
        # remove that analytically instead of an iota/cmp/select lane mask
        # (saves three full-tile VPU ops per step; stays centered, so it is
        # far more stable than the one-pass E[x^2] - mean^2 form).
        sq = sq - float(d_pad - d_true) * (mean * mean)
    var = sq * inv_d
    scale = jax.lax.rsqrt(var + eps) * g          # fold gamma into the rsqrt scale
    return centered * scale + b


def _layernorm_kernel(x_ref, g_ref, b_ref, o_ref, *, eps, d_true, activation):
    y = _layernorm_body(x_ref[...].astype(jnp.float32),
                        g_ref[...], b_ref[...], eps=eps, d_true=d_true)
    if activation is not None:
        y = activation(y)                         # fused elementwise fn, f32
    o_ref[...] = y.astype(o_ref.dtype)


def _prenorm_linear_kernel(x_ref, g_ref, b_ref, w_ref, bl_ref, o_ref, y_ref,
                           *, eps, d_true):
    # Normalize once per row tile (j == 0) into a bf16 VMEM scratch; reuse it
    # for every output-column tile j so the MXU always sees bf16 operands.
    @pl.when(pl.program_id(1) == 0)
    def _():
        y = _layernorm_body(x_ref[...].astype(jnp.float32),
                            g_ref[...], b_ref[...], eps=eps, d_true=d_true)
        y_ref[...] = y.astype(y_ref.dtype)

    out = jnp.dot(y_ref[...], w_ref[...], preferred_element_type=jnp.float32)
    o_ref[...] = (out + bl_ref[...]).astype(o_ref.dtype)


# -----------------------------------------------------------------------------
# Wrappers
# -----------------------------------------------------------------------------

def layernorm_pallas(x2d, gamma_row, beta_row, *, eps=1e-5, d_true=None,
                     activation=None, block_rows=1024):
    """LayerNorm over the last dim (optionally fused with an elementwise fn).

    x2d: (N, D); gamma_row/beta_row: (1, Dp) f32, Dp = round_up(D, 128) with
    zero-padded lanes. Returns (N, D) in x2d.dtype.
    """
    n, d = x2d.shape
    d_pad = gamma_row.shape[-1]
    if d_true is None:
        d_true = d
    xp = x2d if d_pad == d else jnp.pad(x2d, ((0, 0), (0, d_pad - d)))
    tm = _pick_block_rows(n, d_pad, x2d.dtype, block_rows)

    kernel = functools.partial(_layernorm_kernel, eps=eps, d_true=d_true,
                               activation=activation)
    out = pl.pallas_call(
        kernel,
        out_shape=jax.ShapeDtypeStruct((n, d_pad), x2d.dtype),
        grid_spec=pltpu.PrefetchScalarGridSpec(
            num_scalar_prefetch=0,
            grid=(_cdiv(n, tm),),   # ragged last row block handled by Pallas
            in_specs=[
                pl.BlockSpec((tm, d_pad), lambda i: (i, 0)),
                _invariant_spec((1, d_pad), lambda i: (0, 0)),
                _invariant_spec((1, d_pad), lambda i: (0, 0)),
            ],
            out_specs=pl.BlockSpec((tm, d_pad), lambda i: (i, 0)),
        ),
        compiler_params=pltpu.CompilerParams(
            dimension_semantics=("parallel",),
            vmem_limit_bytes=_vmem_limit_bytes(),
        ),
    )(xp, gamma_row, beta_row)
    return out if d_pad == d else out[:, :d]


def prenorm_linear_pallas(x2d, gamma_row, beta_row, w_padded, b_row, *,
                          eps=1e-5, d_true=None, d_out=None, block_rows=512):
    """Fused LayerNorm(D) + Linear(D, D_out), bf16 MXU with f32 accumulation.

    x2d: (N, D); gamma_row/beta_row: (1, Dp) f32; w_padded: (Dp, DOp) bf16;
    b_row: (1, DOp) f32. Dp / DOp are 128-padded with zero lanes.
    """
    n, d = x2d.shape
    d_pad, do_pad = w_padded.shape
    if d_true is None:
        d_true = d
    if d_out is None:
        d_out = do_pad
    xp = x2d if d_pad == d else jnp.pad(x2d, ((0, 0), (0, d_pad - d)))

    tm = _pick_block_rows(n, d_pad, x2d.dtype, block_rows)
    vmem_limit = _vmem_limit_bytes()

    # Column-tile the weight only when it would not comfortably fit in VMEM as
    # a single, single-buffered resident block; otherwise keep it resident so
    # it is DMA'd from HBM exactly once.
    w_item = jnp.dtype(w_padded.dtype).itemsize
    if d_pad * do_pad * w_item <= vmem_limit // 4:
        tn = do_pad
    else:
        tn = max(_LANE, ((vmem_limit // 8) // (d_pad * w_item)) // _LANE * _LANE)
        tn = min(do_pad, tn)
    nc = _cdiv(do_pad, tn)
    single_col = nc == 1
    # TODO(synk): for D so large that even a single (d_pad, tn) weight column
    # block exceeds VMEM, add a K-tiled contraction axis with an f32
    # accumulator (requires two-pass or accumulated LayerNorm statistics).

    if single_col:
        w_spec = _invariant_spec((d_pad, do_pad), lambda i, j: (0, 0))
        bl_spec = _invariant_spec((1, do_pad), lambda i, j: (0, 0))
    else:
        w_spec = pl.BlockSpec((d_pad, tn), lambda i, j: (0, j))
        bl_spec = pl.BlockSpec((1, tn), lambda i, j: (0, j))

    kernel = functools.partial(_prenorm_linear_kernel, eps=eps, d_true=d_true)
    out = pl.pallas_call(
        kernel,
        out_shape=jax.ShapeDtypeStruct((n, do_pad), x2d.dtype),
        grid_spec=pltpu.PrefetchScalarGridSpec(
            num_scalar_prefetch=0,
            grid=(_cdiv(n, tm), nc),
            in_specs=[
                pl.BlockSpec((tm, d_pad), lambda i, j: (i, 0)),
                _invariant_spec((1, d_pad), lambda i, j: (0, 0)),
                _invariant_spec((1, d_pad), lambda i, j: (0, 0)),
                w_spec,
                bl_spec,
            ],
            out_specs=pl.BlockSpec((tm, tn), lambda i, j: (i, j)),
            scratch_shapes=[pltpu.VMEM((tm, d_pad), jnp.bfloat16)],
        ),
        compiler_params=pltpu.CompilerParams(
            dimension_semantics=("parallel", "arbitrary"),
            vmem_limit_bytes=vmem_limit,
        ),
    )(xp, gamma_row, beta_row, w_padded, b_row)
    return out if do_pad == d_out else out[:, :d_out]


# -----------------------------------------------------------------------------
# Module-level equivalents
# -----------------------------------------------------------------------------

class LinearFn:
    """Deterministic Linear(d_in, d_out); recognized by PreNorm for fusion.

    The fused kernel's operands (bf16 128-lane-padded weight, f32 padded bias)
    are precomputed once here so the forward pass does no per-call pad/cast."""

    def __init__(self, key, d_in, d_out):
        kw, kb = jax.random.split(key)
        bound = 1.0 / (d_in ** 0.5)
        self.d_in, self.d_out = d_in, d_out
        self.w = jax.random.uniform(kw, (d_in, d_out), jnp.float32, -bound, bound)
        self.b = jax.random.uniform(kb, (d_out,), jnp.float32, -bound, bound)
        d_pad, do_pad = _round_up(d_in, _LANE), _round_up(d_out, _LANE)
        self.w_padded = jnp.pad(
            self.w, ((0, d_pad - d_in), (0, do_pad - d_out))).astype(jnp.bfloat16)
        self.b_padded = jnp.pad(self.b, (0, do_pad - d_out)).reshape(1, do_pad)

    def __call__(self, x):
        return jnp.dot(x, self.w) + self.b


# Elementwise fns that can be fused directly into the LayerNorm kernel body.
_FUSABLE_ELEMENTWISE = (jax.nn.gelu, jax.nn.relu, jax.nn.silu, jnp.tanh)


class PreNorm:
    """JAX/Pallas equivalent of the PyTorch PreNorm(dim, fn) module."""

    def __init__(self, dim, fn, eps=1e-5):
        self.dim = dim
        self.fn = fn
        self.eps = eps
        # nn.LayerNorm default init: weight = ones, bias = zeros. Stored
        # pre-padded (zero lanes) so the wrappers never pad params per call.
        self.gamma = jnp.ones((dim,), jnp.float32)
        self.beta = jnp.zeros((dim,), jnp.float32)
        d_pad = _round_up(dim, _LANE)
        self._gamma_row = jnp.pad(self.gamma, (0, d_pad - dim)).reshape(1, d_pad)
        self._beta_row = jnp.pad(self.beta, (0, d_pad - dim)).reshape(1, d_pad)

    def __call__(self, x, **kwargs):
        orig_shape = x.shape
        x2d = x.reshape(-1, self.dim)
        if isinstance(self.fn, LinearFn) and not kwargs:
            # Fused path: normalized activations never round-trip HBM; bf16 MXU.
            out = prenorm_linear_pallas(
                x2d, self._gamma_row, self._beta_row,
                self.fn.w_padded, self.fn.b_padded,
                eps=self.eps, d_true=self.dim, d_out=self.fn.d_out)
            return out.reshape(orig_shape[:-1] + (self.fn.d_out,))
        fuse_act = (not kwargs) and any(self.fn is f for f in _FUSABLE_ELEMENTWISE)
        normed = layernorm_pallas(
            x2d, self._gamma_row, self._beta_row, eps=self.eps, d_true=self.dim,
            activation=self.fn if fuse_act else None)
        if fuse_act:
            return normed.reshape(orig_shape)
        # Generic fallback: Pallas LayerNorm, then arbitrary fn in plain JAX.
        return self.fn(normed.reshape(orig_shape), **kwargs)


if __name__ == "__main__":
    key = jax.random.PRNGKey(0)
    k_x, k_fn = jax.random.split(key)

    B, S, D = 2, 8, 32
    x = jax.random.normal(k_x, (B, S, D), dtype=jnp.float32)

    fn = LinearFn(k_fn, D, D)
    prenorm = PreNorm(D, fn)

    out = jax.block_until_ready(prenorm(x))
    assert out.shape == (B, S, D)

    # float64 numpy reference of LayerNorm + Linear (gamma=1, beta=0).
    xn = np.asarray(x, dtype=np.float64)
    mean = xn.mean(-1, keepdims=True)
    var = ((xn - mean) ** 2).mean(-1, keepdims=True)
    normed_ref = (xn - mean) / np.sqrt(var + 1e-5)
    ref = normed_ref @ np.asarray(fn.w, np.float64) + np.asarray(fn.b, np.float64)
    # bf16 MXU operands -> ~1e-2-scale absolute error vs the f64 reference.
    assert np.allclose(np.asarray(out, np.float64), ref, atol=5e-2, rtol=5e-2)

    # LayerNorm kernel with gelu fused into the kernel body.
    prenorm_gelu = PreNorm(D, jax.nn.gelu)
    out2 = jax.block_until_ready(prenorm_gelu(x))
    ref2 = jax.nn.gelu(jnp.asarray(normed_ref, jnp.float32))
    assert out2.shape == (B, S, D)
    assert jnp.allclose(out2, ref2, atol=1e-4, rtol=1e-4)

    # Generic (non-fusable) fn path: Pallas LayerNorm + plain-JAX fn.
    prenorm_generic = PreNorm(D, lambda t: t * 2.0)
    out3 = jax.block_until_ready(prenorm_generic(x))
    assert jnp.allclose(out3, 2.0 * jnp.asarray(normed_ref, jnp.float32),
                        atol=1e-4, rtol=1e-4)

    print("KERNEL_OK")
</pallas_src>

<mosaic_0001>
module attributes {stable_mosaic.version = 11 : i64} {
  func.func @_prenorm_linear_kernel(%arg0: i32, %arg1: i32, %arg2: memref<8x128xf32, #tpu.memory_space<vmem>>, %arg3: memref<1x128xf32, #tpu.memory_space<vmem>>, %arg4: memref<1x128xf32, #tpu.memory_space<vmem>>, %arg5: memref<128x128xbf16, #tpu.memory_space<vmem>>, %arg6: memref<1x128xf32, #tpu.memory_space<vmem>>, %arg7: memref<8x128xf32, #tpu.memory_space<vmem>>, %arg8: memref<8x128xbf16, #tpu.memory_space<vmem>>) attributes {dimension_semantics = [#tpu.dimension_semantics<parallel>, #tpu.dimension_semantics<arbitrary>], iteration_bounds = array<i64: 2, 1>, scalar_prefetch = 0 : i64, scratch_operands = 1 : i64, tpu.core_type = #tpu.core_type<tc>, window_params = [{transform_indices = @transform_0, window_bounds = array<i64: 8, 128>}, {pipeline_mode = #tpu.pipeline_mode<synchronous>, transform_indices = @transform_1, window_bounds = array<i64: 1, 128>}, {pipeline_mode = #tpu.pipeline_mode<synchronous>, transform_indices = @transform_2, window_bounds = array<i64: 1, 128>}, {pipeline_mode = #tpu.pipeline_mode<synchronous>, transform_indices = @transform_3, window_bounds = array<i64: 128, 128>}, {pipeline_mode = #tpu.pipeline_mode<synchronous>, transform_indices = @transform_4, window_bounds = array<i64: 1, 128>}, {transform_indices = @transform_5, window_bounds = array<i64: 8, 128>}]} {
    %c0_i32 = arith.constant 0 : i32
    %0 = arith.cmpi eq, %arg1, %c0_i32 : i32
    %1 = arith.extui %0 : i1 to i32
    %c0_i32_0 = arith.constant 0 : i32
    %2 = arith.cmpi ne, %1, %c0_i32_0 : i32
    scf.if %2 {
      %c0_8 = arith.constant 0 : index
      %c0_9 = arith.constant 0 : index
      %10 = vector.load %arg2[%c0_8, %c0_9] : memref<8x128xf32, #tpu.memory_space<vmem>>, vector<8x128xf32>
      %c0_10 = arith.constant 0 : index
      %c0_11 = arith.constant 0 : index
      %11 = vector.load %arg3[%c0_10, %c0_11] : memref<1x128xf32, #tpu.memory_space<vmem>>, vector<1x128xf32>
      %c0_12 = arith.constant 0 : index
      %c0_13 = arith.constant 0 : index
      %12 = vector.load %arg4[%c0_12, %c0_13] : memref<1x128xf32, #tpu.memory_space<vmem>>, vector<1x128xf32>
      %cst_14 = arith.constant dense<0.000000e+00> : vector<8xf32>
      %13 = vector.multi_reduction <add>, %10, %cst_14 [1] : vector<8x128xf32> to vector<8xf32>
      %14 = vector.shape_cast %13 : vector<8xf32> to vector<8x1xf32>
      %cst_15 = arith.constant 3.125000e-02 : f32
      %15 = vector.broadcast %cst_15 : f32 to vector<8x1xf32>
      %16 = arith.mulf %14, %15 : vector<8x1xf32>
      %17 = vector.broadcast %16 : vector<8x1xf32> to vector<8x128xf32>
      %18 = arith.subf %10, %17 : vector<8x128xf32>
      %19 = arith.mulf %18, %18 : vector<8x128xf32>
      %cst_16 = arith.constant dense<0.000000e+00> : vector<8xf32>
      %20 = vector.multi_reduction <add>, %19, %cst_16 [1] : vector<8x128xf32> to vector<8xf32>
      %21 = vector.shape_cast %20 : vector<8xf32> to vector<8x1xf32>
      %22 = arith.mulf %16, %16 : vector<8x1xf32>
      %cst_17 = arith.constant 9.600000e+01 : f32
      %23 = vector.broadcast %cst_17 : f32 to vector<8x1xf32>
      %24 = arith.mulf %23, %22 : vector<8x1xf32>
      %25 = arith.subf %21, %24 : vector<8x1xf32>
      %cst_18 = arith.constant 3.125000e-02 : f32
      %26 = vector.broadcast %cst_18 : f32 to vector<8x1xf32>
      %27 = arith.mulf %25, %26 : vector<8x1xf32>
      %cst_19 = arith.constant 9.99999974E-6 : f32
      %28 = vector.broadcast %cst_19 : f32 to vector<8x1xf32>
      %29 = arith.addf %27, %28 : vector<8x1xf32>
      %30 = math.rsqrt %29 : vector<8x1xf32>
      %31 = vector.broadcast %30 : vector<8x1xf32> to vector<8x128xf32>
      %32 = vector.broadcast %11 : vector<1x128xf32> to vector<8x128xf32>
      %33 = arith.mulf %31, %32 : vector<8x128xf32>
      %34 = arith.mulf %18, %33 : vector<8x128xf32>
      %35 = vector.broadcast %12 : vector<1x128xf32> to vector<8x128xf32>
      %36 = arith.addf %34, %35 : vector<8x128xf32>
      %37 = arith.truncf %36 : vector<8x128xf32> to vector<8x128xbf16>
      %c0_20 = arith.constant 0 : index
      %c0_21 = arith.constant 0 : index
      %38 = vector.load %arg8[%c0_20, %c0_21] : memref<8x128xbf16, #tpu.memory_space<vmem>>, vector<8x128xbf16>
      tpu.vector_store %arg8[%c0_20, %c0_21], %37 {strides = array<i32>} : memref<8x128xbf16, #tpu.memory_space<vmem>>, vector<8x128xbf16>,
    } else {
    }
    %c0 = arith.constant 0 : index
    %c0_1 = arith.constant 0 : index
    %3 = vector.load %arg8[%c0, %c0_1] : memref<8x128xbf16, #tpu.memory_space<vmem>>, vector<8x128xbf16>
    %c0_2 = arith.constant 0 : index
    %c0_3 = arith.constant 0 : index
    %4 = vector.load %arg5[%c0_2, %c0_3] : memref<128x128xbf16, #tpu.memory_space<vmem>>, vector<128x128xbf16>
    %cst = arith.constant dense<0.000000e+00> : vector<8x128xf32>
    %5 = tpu.matmul %3, %4, %cst {dimension_numbers = #tpu.dot_dimension_numbers<[1], [0], [0], [1], [0, 0, 1, 1], [], []>} : vector<8x128xbf16>, vector<128x128xbf16>, vector<8x128xf32> -> vector<8x128xf32>
    %c0_4 = arith.constant 0 : index
    %c0_5 = arith.constant 0 : index
    %6 = vector.load %arg6[%c0_4, %c0_5] : memref<1x128xf32, #tpu.memory_space<vmem>>, vector<1x128xf32>
    %7 = vector.broadcast %6 : vector<1x128xf32> to vector<8x128xf32>
    %8 = arith.addf %5, %7 : vector<8x128xf32>
    %c0_6 = arith.constant 0 : index
    %c0_7 = arith.constant 0 : index
    %9 = vector.load %arg7[%c0_6, %c0_7] : memref<8x128xf32, #tpu.memory_space<vmem>>, vector<8x128xf32>
    tpu.vector_store %arg7[%c0_6, %c0_7], %8 {strides = array<i32>} : memref<8x128xf32, #tpu.memory_space<vmem>>, vector<8x128xf32>,
    return
  }
  func.func @transform_0(%arg0: i32, %arg1: i32) -> (i32, i32) {
    %c0_i32 = arith.constant 0 : i32
    %c0_i32_0 = arith.constant 0 : i32
    return %arg0, %c0_i32 : i32, i32
  }
  func.func @transform_1(%arg0: i32, %arg1: i32) -> (i32, i32) {
    %c0_i32 = arith.constant 0 : i32
    %c0_i32_0 = arith.constant 0 : i32
    %c0_i32_1 = arith.constant 0 : i32
    return %c0_i32, %c0_i32_0 : i32, i32
  }
  func.func @transform_2(%arg0: i32, %arg1: i32) -> (i32, i32) {
    %c0_i32 = arith.constant 0 : i32
    %c0_i32_0 = arith.constant 0 : i32
    %c0_i32_1 = arith.constant 0 : i32
    return %c0_i32, %c0_i32_0 : i32, i32
  }
  func.func @transform_3(%arg0: i32, %arg1: i32) -> (i32, i32) {
    %c0_i32 = arith.constant 0 : i32
    %c0_i32_0 = arith.constant 0 : i32
    %c0_i32_1 = arith.constant 0 : i32
    return %c0_i32, %c0_i32_0 : i32, i32
  }
  func.func @transform_4(%arg0: i32, %arg1: i32) -> (i32, i32) {
    %c0_i32 = arith.constant 0 : i32
    %c0_i32_0 = arith.constant 0 : i32
    %c0_i32_1 = arith.constant 0 : i32
    return %c0_i32, %c0_i32_0 : i32, i32
  }
  func.func @transform_5(%arg0: i32, %arg1: i32) -> (i32, i32) {
    %c0_i32 = arith.constant 0 : i32
    return %arg0, %arg1 : i32, i32
  }
}

</mosaic_0001>

<bundles_post_ra>
// kernel: tpu_custom_call.1
= control target key start
LH: loop header
LB: loop body
LE: loop exit
PB: predicated region body
PF: predicated region fallthrough
CT: control target
= control target key end

     0   :  { %s1035_s0 = inlined_call_operand.hbm [shape: f32[16,128], index: 0, kind: input, shape index: {}]   ;;  %s1036_s1 = inlined_call_operand.vmem [shape: f32[1,128], index: 1, kind: input, shape index: {}]   ;;  %s1037_s2 = inlined_call_operand.vmem [shape: f32[1,128], index: 2, kind: input, shape index: {}]   ;;  %s1038_s3 = inlined_call_operand.hbm [shape: bf16[128,128], index: 3, kind: input, shape index: {}]   ;;  %s1039_s4 = inlined_call_operand.vmem [shape: f32[1,128], index: 4, kind: input, shape index: {}]   ;;  %s1040_s5 = inlined_call_operand.hbm [shape: f32[16,128], index: 5, kind: output, shape index: {}]  }
   0x1   :  { %1043 = sst [smem:[#allocation13_spill]] %s1038_s3 }
   0x2   :  { %10 = vsyncpa [#allocation4], 0 }
   0x3   :  { %12 = vsyncpa [#allocation4 + $0x1], 0 }
   0x4   :  { %13 = vsyncpa [#allocation7], 0 }
   0x5   :  { %14 = vsyncpa [#allocation5], 0 }
   0x6   :  { %16 = vsyncpa [#allocation5 + $0x1], 0  ;;  %s843_s18 = smov 0   ;;  %s845_s19 = smov 0  }
   0x7   :  { %s847_s20 = smov 0   ;;  %s849_s21 = smov 0  }
   0x8   :  { %s851_s22 = smov 0   ;;  %s853_s23 = smov 0  }
   0x9 LB: > { %s524_s24 = sadd.s32 4294967295, %s804_s23   ;;  %s525_s25 = sadd.s32 4294967294, %s804_s23   ;;  %s804_s23 = sphi %s853_s23, %s22_s23   ;;  %s800_s22 = sphi %s851_s22, %s1063_s22   ;;  %s796_s21 = sphi %s849_s21, %s1062_s21   ;;  %s792_s20 = sphi %s847_s20, %s1061_s20   ;;  %s788_s19 = sphi %s845_s19, %s1060_s19   ;;  %s784_s18 = sphi %s843_s18, %s1059_s18  }
   0xa   : > { %p54_p0 = scmp.ne.s32.totalorder %s788_s19, %s784_s18  ;;  %p877_p1 = scmp.eq.s32.totalorder %s524_s24, 0 }
   0xb   : > { %p881_p2 = scmp.eq.s32.totalorder %s524_s24, 1  ;;  %p170_p3 = scmp.eq.s32.totalorder %s525_s25, 1 }
   0xc   : > { %p887_p4 = por %p877_p1, %p54_p0  ;;  %p526_p5 = scmp.ge.s32.totalorder %s804_s23, 1 }
   0xd   : > { %p892_p6 = por %p170_p3, %p54_p0  ;;  %p177_p7 = scmp.lt.s32.totalorder %s804_s23, 3 }
   0xe   : > { %s1046_s28 = scalar_select %p887_p4, 1, 0 }
   0xf   : > { %s1047_s29 = scalar_select %p892_p6, 1, 0 }
  0x10   : > { %p897_p8 = pnand %p526_p5, %p177_p7  ;;  %s806_s6 = smov [#allocation6]  }
  0x11   : > { %s195_s7 = sshll.u32 %s806_s6, 4  ;;  %s34_s9 = sadd.s32 1, %s800_s22  ;;  %s196_s7 = int_to_ptr.vmem [resolvable:$true] %s195_s7 }
  0x12   : > { %p587_p9 = pneg %p897_p8  ;;  %s677_s10 = scalar_lea.vmem %s196_s7, 1024 }
  0x13   : > { %p678_p13 = scmp.ne.s32.totalorder %s196_s7, %s677_s10  ;;  %p685_p5 = scmp.lt.s32.totalorder %s196_s7, %s196_s7 }
  0x14   : > { %p906_p11 = pnand %p587_p9, %p877_p1  ;;  %p686_p7 = scmp.lt.s32.totalorder %s677_s10, %s677_s10 }
  0x16   : > { %p668_p12 = pneg %p906_p11  ;;  %p687_p6 = por %p686_p7, %p685_p5 }
  0x18   : > { %p680_p0 = pnand %p678_p13, %p668_p12 }
  0x1a   : > { %p681_p3 = pneg %p680_p0 }
  0x1c   : > { %p688_p4 = pnand %p687_p6, %p681_p3 }
  0x1e   : > { %691 = shalt.err (!%p688_p4)
}
  0x1f   : > { %s807_s11 = smov 64   ;;  %s808_s12 = smov 4  }
  0x20   : > { %s1050_s3 = sld [smem:[#allocation13_spill]]  ;;  %p36_p6 = scmp.ge.s32.totalorder %s34_s9, 2 }
  0x21   : > { %s41_s15 = sadd.s32 1, %s792_s20  ;;  %p48_p4 = scmp.ne.s32.totalorder %s792_s20, %s788_s19 }
  0x22   : > { %p49_p9 = scmp.eq.s32.totalorder %s804_s23, 0  ;;  %s1065_s9 = smov (%p36_p6, %s34_s9), 0 }
  0x23   : > { %1051 = sst [smem:[#allocation12_spill]] %s1065_s9  ;;  %p930_p13 = por %p881_p2, %p48_p4 }
  0x24   : > { %p924_p12 = por %p49_p9, %p48_p4  ;;  %s38_s24 = ssub.s32 %s800_s22, %s1065_s9 }
  0x25   : > { %p600_p0 = scmp.lt.s32.totalorder %s804_s23, 2  ;;  %s212_s25 = sand.u32 1, %s792_s20  }
  0x26   : > { %590 = dma.hbm_to_vmem [thread:$0]  (!%p906_p11), %s1050_s3, 1024, %s196_s7, [#allocation7], %s807_s11, %s807_s11, %s808_s12  }
  0x27   : > { %p39_p11 = scmp.eq.s32.totalorder %s38_s24, 0  ;;  %s529_s6 = sshll.u32 %s212_s25, 3 }
  0x28   : > { %s530_s8 = sshll.u32 %s800_s22, 7  ;;  %s216_s13 = scalar_lea.vmem [#allocation3], %s529_s6 }
  0x29   : > { %s939_s7 = scalar_select %p39_p11, %s792_s20, %s41_s15  }
  0x2a   : > { %s221_s12 = scalar_lea.hbm %s1035_s0, %s530_s8  ;;  %s223_s14 = sshll.u32 %s216_s13, 4  ;;  %s224_s14 = int_to_ptr.vmem [resolvable:$true] %s223_s14 }
  0x2b   : > { %p947_p2 = pnand %p600_p0, %p924_p12  ;;  %s213_s3 = scalar_lea.sflag [#allocation4], %s212_s25 }
  0x2c   : > { %s705_s24 = scalar_lea.vmem %s224_s14, 128  ;;  %s809_s15 = smov [#allocation3]  }
  0x2d   : > { %p694_p3 = pneg %p947_p2  ;;  %p706_p5 = scmp.ne.s32.totalorder %s224_s14, %s705_s24 }
  0x2e   : > { %s710_s9 = sshll.u32 %s809_s15, 4  ;;  %s711_s9 = int_to_ptr.vmem [resolvable:$false] %s710_s9 }
  0x2f   : > { %p708_p7 = pnand %p706_p5, %p694_p3  ;;  %s712_s8 = scalar_lea.vmem %s711_s9, 256 }
  0x30   : > { %p713_p4 = scmp.lt.s32.totalorder %s224_s14, %s711_s9  ;;  %p714_p9 = scmp.lt.s32.totalorder %s712_s8, %s705_s24 }
  0x31   : > { %p709_p6 = pneg %p708_p7 }
  0x32   : > { %p715_p11 = por %p714_p9, %p713_p4 }
  0x34   : > { %p716_p10 = pnand %p715_p11, %p709_p6 }
  0x36   : > { %719 = shalt.err (!%p716_p10)
}
  0x37   : > { %594 = dma.hbm_to_vmem [thread:$0]  (!%p947_p2), %s221_s12, 128, %s224_s14, %s213_s3  }
  0x38   : > { %232 = sbr.rel (%p897_p8) target bundleno = 592 (0x250), region = 40  ;;  %s958_s16 = sand.u32 (!%p897_p8), 1, %s788_s19  }
  0x39   : > { %s532_s25 = sshll.u32 (!%p897_p8), %s958_s16, 3  ;;  %s235_s6 = scalar_lea.sflag (!%p897_p8), [#allocation4], %s958_s16 }
  0x3a   : > { %s238_s9 = scalar_lea.vmem (!%p897_p8), [#allocation3], %s532_s25  ;;  %p1055_p12 = scmp.ne.s32.totalorder (!%p897_p8), %s1046_s28, 0 }
  0x3d   : > { %771 = dma.done.wait (%p1055_p12), %s235_s6, 128  }
  0x3e   : > { %773 = vsyncadd (%p1055_p12), %s235_s6, 4294967168 }
  0x3f   : > { %775 = dma.done.wait (%p877_p1), [#allocation7], 1024  }
  0x40   : > { %777 = vsyncadd (%p877_p1), [#allocation7], 4294966272  ;;  %v274_v0 = vld [vmem:[%s238_s9] sm:$0xff]  ;;  %v810_v6 = vmov 0.0   ;;  %v658_v8 = vld [vmem:[#allocation6 + $0x28] sm:$0xff]   ;;  %vm811_vm0 = vmmov 0  }
  0x41   : > { %277 = vadd.xlane.f32.xlu0 %v274_v0  ;;  %v656_v5 = vld [vmem:[#allocation6 + $0x38] sm:$0xff]   ;;  %559 = vmatprep.subr.bf16.mxu0 %v810_v6  ;;  %v657_v7 = vld [vmem:[#allocation6 + $0x30] sm:$0xff]   ;;  %v659_v9 = vld [vmem:[#allocation6 + $0x20] sm:$0xff]   ;;  %s547_s12 = sshll.u32 %s796_s21, 7  ;;  %s268_s13 = scalar_lea.vmem [#allocation8], %s532_s25 }
  0x42   : > { %560 = vmatpush3.bf16.msra.mxu0 %v656_v5  ;;  %v660_v10 = vld [vmem:[#allocation6 + $0x18] sm:$0xff]   ;;  %v661_v11 = vld [vmem:[#allocation6 + $0x10] sm:$0xff]   ;;  %v662_v12 = vld [vmem:[#allocation6 + $0x8] sm:$0xff]   ;;  %575 = vmatprep.mubr.msk.bf16.mxu0 %vm811_vm0, %v810_v6  ;;  %s435_s14 = sshll.u32 %s268_s13, 4  ;;  %s987_s15 = scalar_lea.hbm %s1040_s5, %s547_s12  ;;  %s989_s14 = int_to_ptr.vmem [resolvable:$true] %s435_s14 }
  0x43   : > { %561 = vmatprep.subr.bf16.mxu0 %v810_v6  ;;  %v663_v13 = vld [vmem:[#allocation6] sm:$0xff]   ;;  %v535_v20 = vld [vmem:[%s1036_s1] ss:$0 sm:$0xff]  ;;  %s421_s8 = scalar_lea.sflag [#allocation5], %s958_s16  ;;  %s720_s21 = scalar_lea.vmem %s989_s14, 128 }
  0x44   : > { %v536_v23 = vld [vmem:[%s1037_s2] ss:$0 sm:$0xff]  ;;  %p721_p1 = scmp.ne.s32.totalorder %s989_s14, %s720_s21  ;;  %s812_s25 = smov [#allocation8]  }
  0x45   : > { %v537_v28 = vld [vmem:[%s1039_s4] ss:$0 sm:$0xff]  ;;  %s724_s6 = sshll.u32 %s812_s25, 4  ;;  %s725_s6 = int_to_ptr.vmem [resolvable:$false] %s724_s6 }
  0x46   : > { %562 = vmatpush3.bf16.msra.mxu0 %v657_v7  ;;  %p722_p8 = pnand %p721_p1, %p930_p13  ;;  %s726_s9 = scalar_lea.vmem %s725_s6, 256 }
  0x47   : > { %563 = vmatprep.subr.bf16.mxu0 %v810_v6  ;;  %p727_p0 = scmp.lt.s32.totalorder %s989_s14, %s725_s6  ;;  %p728_p2 = scmp.lt.s32.totalorder %s726_s9, %s720_s21 }
  0x48   : > { %p723_p10 = pneg %p722_p8 }
  0x49   : > { %p729_p3 = por %p728_p2, %p727_p0 }
  0x4a   : > { %564 = vmatpush3.bf16.msra.mxu0 %v658_v8 }
  0x4b   : > { %565 = vmatprep.subr.bf16.mxu0 %v810_v6  ;;  %p730_p5 = pnand %p729_p3, %p723_p10 }
  0x4e   : > { %566 = vmatpush3.bf16.msra.mxu0 %v659_v9 }
  0x4f   : > { %567 = vmatprep.subr.bf16.mxu0 %v810_v6 }
  0x52   : > { %568 = vmatpush3.bf16.msra.mxu0 %v660_v10 }
  0x53   : > { %569 = vmatprep.subr.bf16.mxu0 %v810_v6 }
  0x56   : > { %570 = vmatpush3.bf16.msra.mxu0 %v661_v11 }
  0x57   : > { %571 = vmatprep.subr.bf16.mxu0 %v810_v6 }
  0x5a   : > { %572 = vmatpush3.bf16.msra.mxu0 %v662_v12 }
  0x5b   : > { %573 = vmatprep.subr.bf16.mxu0 %v810_v6 }
  0x5e   : > { %574 = vmatpush3.bf16.msra.mxu0 %v663_v13 }
  0xca   : > { %v278_v1 = vpop.xlane.xlu0 %277 }
  0xcb   : > { %v279_v2 = vmul.f32 0.03125, %v278_v1 }
  0xcd   : > { %v280_v3 = vsub.f32 %v274_v0, %v279_v2  ;;  %v284_v14 = vmul.f32 %v279_v2, %v279_v2 }
  0xcf   : > { %v281_v4 = vmul.f32 %v280_v3, %v280_v3  ;;  %v285_v15 = vmul.f32 96.0, %v284_v14 }
  0xd1   : > { %282 = vadd.xlane.f32.xlu0 %v281_v4 }
 0x15a   : > { %v283_v16 = vpop.xlane.xlu0 %282 }
 0x15b   : > { %v286_v17 = vsub.f32 %v283_v16, %v285_v15 }
 0x15d   : > { %v287_v18 = vmul.f32 0.03125, %v286_v17 }
 0x15f   : > { %v288_v19 = vadd.f32 1e-05, %v287_v18 }
 0x161   : > { %664 = vrsqrt.f32 %v288_v19 }
 0x16e   : > { %v665_v21 = vpop.eup %664 }
 0x16f   : > { %v296_v22 = vmul.f32 %v665_v21, %v535_v20 }
 0x171   : > { %v297_v24 = vmul.f32 %v296_v22, %v280_v3 }
 0x173   : > { %v304_v25 = vadd.f32 %v536_v23, %v297_v24 }
 0x175   : > { %v305_v26 = vpack.c.bf16 %v304_v25, %v304_v25 }
 0x177   : > { %306 = vst [vmem:[#allocation2] sm:$0xf] %v305_v26 }
 0x17e   : > { %v307_v27 = vld [vmem:[#allocation2] sm:$0xf] }
 0x17f   : > { %576 = vmatmul.mubr.bf16.vlgmr.msra.gmra.mxu0 %v307_v27 }
 0x23f   : > { %v413_v29 = vpop.f32.mrf.mxu0 }
 0x240   : > { %v414_v30 = vadd.f32 %v537_v28, %v413_v29 }
 0x241   : > { %v577_v31 = vpop.f32.mrf.mxu0 }
 0x242   : > { %419 = vst [vmem:[%s268_s13] sm:$0xff] %v414_v30 }
 0x243   : > { %v416_v32 = vpop.f32.mrf.mxu0 }
 0x244   : > { %733 = shalt.err (!%p730_p5)
}
 0x245   : > { %s734_s3 = scalar_lea.hbm %s987_s15, 128  ;;  %s738_s28 = scalar_lea.hbm %s1040_s5, 256 }
 0x246   : > { %p735_p7 = scmp.ne.s32.totalorder %s987_s15, %s734_s3  ;;  %p739_p9 = scmp.lt.s32.totalorder %s987_s15, %s1040_s5 }
 0x247   : > { %p740_p11 = scmp.lt.s32.totalorder %s738_s28, %s734_s3 }
 0x248   : > { %p736_p6 = pnand %p735_p7, %p930_p13 }
 0x249   : > { %p741_p12 = por %p740_p11, %p739_p9 }
 0x24a   : > { %p737_p4 = pneg %p736_p6 }
 0x24c   : > { %p742_p1 = pnand %p741_p12, %p737_p4 }
 0x24e   : > { %745 = shalt.err (!%p742_p1)
}
 0x24f   : > { %585 = dma.vmem_to_hbm [thread:$0]  (%p930_p13), %s989_s14, 128, %s987_s15, %s421_s8   ;;  %v578_v33 = vpop.f32.mrf.mxu0 }
 0x250 PF: > { %s447_s11 = sand.u32 1, %s784_s18   ;;  %p1056_p8 = scmp.ne.s32.totalorder %s1047_s29, 0 }
 0x251   : > { %p1057_p10 = scmp.ge.s32.totalorder %s804_s23, 2  ;;  %s448_s12 = scalar_lea.sflag [#allocation5], %s447_s11 }
 0x253   : > { %p596_p0 = pnand %p1057_p10, %p1056_p8 }
 0x255   : > { %p597_p2 = pneg %p596_p0 }
 0x257   : > { %779 = dma.done.wait (%p597_p2), %s448_s12, 128  }
 0x258   : > { %781 = vsyncadd (%p597_p2), %s448_s12, 4294967168  ;;  %s22_s23 = sadd.s32 1, %s804_s23   ;;  %s1058_s17 = sld [smem:[#allocation12_spill]] }
 0x259   : > { %p19_p3 = scmp.ge.s32.totalorder %s22_s23, 4   ;;  %s1059_s18 = smov %s788_s19 }
 0x25a   : > { %s1060_s19 = smov %s792_s20  ;;  %s1061_s20 = smov %s939_s7 }
 0x25b   : > { %s1062_s21 = smov %s800_s22  ;;  %21 = sbr.rel (!%p19_p3) target bundleno = 9 (0x9), region = 93 }
 0x25e   : > { %s1063_s22 = smov %s1058_s17 }
 0x260   :  { %453 = vsyncpa [#allocation4], 1 }
 0x261   :  { %455 = vsyncpa [#allocation4 + $0x1], 1 }
 0x262   :  { %456 = vsyncpa [#allocation7], 1 }
 0x263   :  { %457 = vsyncpa [#allocation5], 1 }
 0x264   :  { %459 = vsyncpa [#allocation5 + $0x1], 1 }

</bundles_post_ra>
